<compile_context>
chip_gen: v7x
topology: tpu7x:2x2x1
jax: 0.10.0
libtpu: 0.0.40
codegen_flags: <defaults>
</compile_context>

<pallas_src>
import functools

import jax
import jax.numpy as jnp
from jax.experimental import pallas as pl
from jax.experimental.pallas import tpu as pltpu

_LANE = 128


def _weighted_mse_kernel(pred_ref, tgt_ref, out_ref, *, epsilon, only_target_based):
    p = pred_ref[...]
    t = tgt_ref[...]
    if only_target_based:
        w = t + epsilon
    else:
        w = jnp.maximum(p, t) + epsilon
    d = p - t
    out_ref[...] = w * (d * d)


def _round_up(x, m):
    return ((x + m - 1) // m) * m


def _cdiv(a, b):
    return -(-a // b)


def _tile_budget_bytes():
    """Per-tile byte budget + scoped-VMEM limit derived from the chip.

    3 arrays x 2 pipeline buffers = 6 tile-sized VMEM buffers in flight.
    """
    try:
        vmem_cap = pltpu.get_tpu_info().vmem_capacity_bytes
    except Exception:  # pragma: no cover - conservative fallback
        vmem_cap = 64 * 1024 * 1024
    tile_bytes = min(4 * 1024 * 1024, vmem_cap // 16)
    # Footprint is 6 * tile_bytes; leave ~25% headroom, never exceed half
    # of physical VMEM (important on v7x: 64 MiB physical).
    vmem_limit = min(vmem_cap // 2, max(32 * 1024 * 1024, 8 * tile_bytes))
    return tile_bytes, vmem_limit


def weighted_mse_loss(prediction, target, epsilon=0.1, only_target_based=False):
    """Elementwise weighted MSE, same shape/dtype as inputs (no reduction)."""
    assert prediction.shape == target.shape, "prediction/target shape mismatch"
    assert jnp.issubdtype(prediction.dtype, jnp.floating), (
        "weighted_mse_loss expects floating-point inputs"
    )
    orig_shape = prediction.shape
    dtype = prediction.dtype
    total = prediction.size
    itemsize = jnp.dtype(dtype).itemsize

    # Dtype-aware sublane packing: 8 rows (f32), 16 (bf16/f16), 32 (int8/fp8).
    sub_pack = max(8, 8 * (4 // max(itemsize, 1)))

    target_tile_bytes, vmem_limit = _tile_budget_bytes()
    max_tile_rows = max(
        sub_pack,
        (target_tile_bytes // (_LANE * itemsize)) // sub_pack * sub_pack,
    )

    rows = _cdiv(total, _LANE)
    pad = rows * _LANE - total  # 0 for lane-aligned totals, else < 128

    # Cap the tile so mid-size inputs get >= ~4 grid steps (megacore sharding
    # + pipeline ramp on v7x); huge inputs still use the full tile budget.
    tile_rows = min(
        max_tile_rows, max(sub_pack, _round_up(_cdiv(rows, 4), sub_pack))
    )
    grid = (_cdiv(rows, tile_rows),)

    if pad == 0:
        # Lane-aligned fast path: pure reshape, no extra HBM copies. The last
        # grid step may be a partial block; Pallas masks the edge writes.
        p2d = prediction.reshape(rows, _LANE)
        t2d = target.reshape(rows, _LANE)
    else:
        # Unaligned tail: pad only to the 128-lane boundary (never to a tile).
        p2d = jnp.pad(prediction.reshape(-1), (0, pad)).reshape(rows, _LANE)
        t2d = jnp.pad(target.reshape(-1), (0, pad)).reshape(rows, _LANE)

    kernel = functools.partial(
        _weighted_mse_kernel,
        epsilon=float(epsilon),
        only_target_based=bool(only_target_based),
    )

    out2d = pl.pallas_call(
        kernel,
        out_shape=jax.ShapeDtypeStruct((rows, _LANE), dtype),
        grid_spec=pl.GridSpec(
            grid=grid,
            in_specs=[
                pl.BlockSpec((tile_rows, _LANE), lambda i: (i, 0)),
                pl.BlockSpec((tile_rows, _LANE), lambda i: (i, 0)),
            ],
            out_specs=pl.BlockSpec((tile_rows, _LANE), lambda i: (i, 0)),
        ),
        compiler_params=pltpu.CompilerParams(
            dimension_semantics=("parallel",),
            vmem_limit_bytes=vmem_limit,
        ),
    )(p2d, t2d)

    if pad == 0:
        return out2d.reshape(orig_shape)
    return out2d.reshape(-1)[:total].reshape(orig_shape)


def weighted_mse_loss_ref(prediction, target, epsilon=0.1, only_target_based=False):
    if only_target_based:
        weight = target + epsilon
    else:
        weight = jnp.maximum(prediction, target) + epsilon
    return weight * (prediction - target) ** 2


if __name__ == "__main__":
    key = jax.random.PRNGKey(0)
    k1, k2, k3, k4, k5, k6 = jax.random.split(key, 6)

    # NCHW, small shape (lane-aligned, tile-exact): 2*4*16*16 = 2048 = 16*128.
    shape = (2, 4, 16, 16)
    prediction = jax.random.normal(k1, shape, dtype=jnp.float32)
    target = jax.random.normal(k2, shape, dtype=jnp.float32)

    out = jax.block_until_ready(
        weighted_mse_loss(prediction, target, epsilon=0.1, only_target_based=False)
    )
    ref = weighted_mse_loss_ref(prediction, target, epsilon=0.1,
                                only_target_based=False)
    assert out.shape == shape and out.dtype == prediction.dtype
    assert jnp.allclose(out, ref, atol=1e-6, rtol=1e-6)

    # only_target_based branch.
    out_tb = jax.block_until_ready(
        weighted_mse_loss(prediction, target, epsilon=0.1, only_target_based=True)
    )
    ref_tb = weighted_mse_loss_ref(prediction, target, epsilon=0.1,
                                   only_target_based=True)
    assert jnp.allclose(out_tb, ref_tb, atol=1e-6, rtol=1e-6)

    # Lane-aligned but NOT tile-aligned rows (exercises the partial last
    # block on the relaxed fast path, no padding / no output slice).
    shape_pb = (2, 10, 128)  # 2560 elems -> 20 rows; tile_rows=8 -> grid=3
    p_pb = jax.random.normal(k3, shape_pb, dtype=jnp.float32)
    t_pb = jax.random.normal(k4, shape_pb, dtype=jnp.float32)
    out_pb = jax.block_until_ready(weighted_mse_loss(p_pb, t_pb, epsilon=0.1))
    ref_pb = weighted_mse_loss_ref(p_pb, t_pb, epsilon=0.1)
    assert out_pb.shape == shape_pb
    assert jnp.allclose(out_pb, ref_pb, atol=1e-6, rtol=1e-6)

    # Truly non-lane-aligned shape exercises the minimal-pad path.
    shape2 = (3, 5, 7)
    p2 = jax.random.normal(k5, shape2, dtype=jnp.float32)
    t2 = jax.random.normal(k6, shape2, dtype=jnp.float32)
    out2 = jax.block_until_ready(weighted_mse_loss(p2, t2, epsilon=0.1))
    ref2 = weighted_mse_loss_ref(p2, t2, epsilon=0.1)
    assert out2.shape == shape2
    assert jnp.allclose(out2, ref2, atol=1e-6, rtol=1e-6)

    print("KERNEL_OK")
</pallas_src>

<mosaic_0001>
module attributes {stable_mosaic.version = 11 : i64} {
  func.func @_weighted_mse_kernel(%arg0: i32, %arg1: memref<8x128xf32, #tpu.memory_space<vmem>>, %arg2: memref<8x128xf32, #tpu.memory_space<vmem>>, %arg3: memref<8x128xf32, #tpu.memory_space<vmem>>) attributes {dimension_semantics = [#tpu.dimension_semantics<parallel>], iteration_bounds = array<i64: 2>, scalar_prefetch = 0 : i64, scratch_operands = 0 : i64, tpu.core_type = #tpu.core_type<tc>, window_params = [{transform_indices = @transform_0, window_bounds = array<i64: 8, 128>}, {transform_indices = @transform_1, window_bounds = array<i64: 8, 128>}, {transform_indices = @transform_2, window_bounds = array<i64: 8, 128>}]} {
    %c0 = arith.constant 0 : index
    %c0_0 = arith.constant 0 : index
    %0 = vector.load %arg1[%c0, %c0_0] : memref<8x128xf32, #tpu.memory_space<vmem>>, vector<8x128xf32>
    %c0_1 = arith.constant 0 : index
    %c0_2 = arith.constant 0 : index
    %1 = vector.load %arg2[%c0_1, %c0_2] : memref<8x128xf32, #tpu.memory_space<vmem>>, vector<8x128xf32>
    %2 = arith.maximumf %0, %1 : vector<8x128xf32>
    %cst = arith.constant 1.000000e-01 : f32
    %3 = vector.broadcast %cst : f32 to vector<8x128xf32>
    %4 = arith.addf %2, %3 : vector<8x128xf32>
    %5 = arith.subf %0, %1 : vector<8x128xf32>
    %6 = arith.mulf %5, %5 : vector<8x128xf32>
    %7 = arith.mulf %4, %6 : vector<8x128xf32>
    %c0_3 = arith.constant 0 : index
    %c0_4 = arith.constant 0 : index
    %8 = vector.load %arg3[%c0_3, %c0_4] : memref<8x128xf32, #tpu.memory_space<vmem>>, vector<8x128xf32>
    tpu.vector_store %arg3[%c0_3, %c0_4], %7 {strides = array<i32>} : memref<8x128xf32, #tpu.memory_space<vmem>>, vector<8x128xf32>,
    return
  }
  func.func @transform_0(%arg0: i32) -> (i32, i32) {
    %c0_i32 = arith.constant 0 : i32
    %c0_i32_0 = arith.constant 0 : i32
    return %arg0, %c0_i32 : i32, i32
  }
  func.func @transform_1(%arg0: i32) -> (i32, i32) {
    %c0_i32 = arith.constant 0 : i32
    %c0_i32_0 = arith.constant 0 : i32
    return %arg0, %c0_i32 : i32, i32
  }
  func.func @transform_2(%arg0: i32) -> (i32, i32) {
    %c0_i32 = arith.constant 0 : i32
    %c0_i32_0 = arith.constant 0 : i32
    return %arg0, %c0_i32 : i32, i32
  }
}

</mosaic_0001>

<bundles_post_ra>
// kernel: tpu_custom_call.1
= control target key start
LH: loop header
LB: loop body
LE: loop exit
PB: predicated region body
PF: predicated region fallthrough
CT: control target
= control target key end

     0   :  { %7 = vsyncpa [#allocation3], 0  ;;  %s736_s0 = inlined_call_operand.hbm [shape: f32[16,128], index: 0, kind: input, shape index: {}]   ;;  %s737_s1 = inlined_call_operand.hbm [shape: f32[16,128], index: 1, kind: input, shape index: {}]   ;;  %s738_s2 = inlined_call_operand.hbm [shape: f32[16,128], index: 2, kind: output, shape index: {}]  }
   0x1   :  { %9 = vsyncpa [#allocation3 + $0x1], 0 }
   0x2   :  { %10 = vsyncpa [#allocation6], 0 }
   0x3   :  { %12 = vsyncpa [#allocation6 + $0x1], 0 }
   0x4   :  { %13 = vsyncpa [#allocation4], 0 }
   0x5   :  { %15 = vsyncpa [#allocation4 + $0x1], 0  ;;  %s527_s9 = smov 0   ;;  %s529_s10 = smov 0  }
   0x6   :  { %s531_s11 = smov 0   ;;  %s533_s12 = smov 0  }
   0x7 LB: > { %s548_s13 = sadd.s32 4294967295, %s507_s12   ;;  %s311_s14 = sadd.s32 4294967294, %s507_s12   ;;  %s507_s12 = sphi %s533_s12, %s757_s12   ;;  %s503_s11 = sphi %s531_s11, %s756_s11   ;;  %s499_s10 = sphi %s529_s10, %s755_s10   ;;  %s495_s9 = sphi %s527_s9, %s754_s9  }
   0x8   : > { %s552_s15 = sadd.s32 1, %s507_s12   ;;  %s28_s16 = sadd.s32 1, %s503_s11 }
   0x9   : > { %s25_s17 = ssub.s32 %s507_s12, %s552_s15  ;;  %p35_p0 = scmp.ne.s32.totalorder %s503_s11, %s499_s10 }
   0xa   : > { %p26_p1 = scmp.eq.s32.totalorder %s25_s17, 0  ;;  %p36_p2 = scmp.eq.s32.totalorder %s507_s12, 0 }
   0xb   : > { %p41_p3 = scmp.ne.s32.totalorder %s499_s10, %s495_s9  ;;  %p42_p4 = scmp.eq.s32.totalorder %s548_s13, 0 }
   0xc   : > { %s564_s18 = scalar_select %p26_p1, %s503_s11, %s28_s16  }
   0xd   : > { %p566_p5 = por %p36_p2, %p35_p0  ;;  %p570_p6 = por %p42_p4, %p41_p3 }
   0xe   : > { %p91_p7 = scmp.eq.s32.totalorder %s548_s13, 1  ;;  %p97_p8 = scmp.eq.s32.totalorder %s311_s14, 1 }
   0xf   : > { %s742_s20 = scalar_select %p570_p6, 1, 0 }
  0x10   : > { %p343_p10 = scmp.lt.s32.totalorder %s507_s12, 2  ;;  %p577_p11 = por %p91_p7, %p35_p0 }
  0x11   : > { %p581_p12 = por %p97_p8, %p41_p3  ;;  %s586_s23 = sand.u32 1, %s503_s11  }
  0x12   : > { %s743_s21 = scalar_select %p577_p11, 1, 0 }
  0x13   : > { %s744_s22 = scalar_select %p581_p12, 1, 0 }
  0x14   : > { %s315_s24 = sshll.u32 %s507_s12, 7  ;;  %s314_s25 = sshll.u32 %s586_s23, 3 }
  0x15   : > { %s595_s28 = scalar_lea.hbm %s736_s0, %s315_s24  ;;  %s121_s29 = scalar_lea.vmem [#allocation2], %s314_s25 }
  0x16   : > { %s128_s30 = sshll.u32 %s121_s29, 4  ;;  %p601_p13 = pnand %p343_p10, %p566_p5  ;;  %s605_s30 = int_to_ptr.vmem [resolvable:$true] %s128_s30 }
  0x17   : > { %s118_s4 = scalar_lea.sflag [#allocation3], %s586_s23  ;;  %s377_s5 = scalar_lea.hbm %s595_s28, 128 }
  0x18   : > { %p378_p2 = scmp.ne.s32.totalorder %s595_s28, %s377_s5  ;;  %p379_p3 = pneg %p601_p13 }
  0x19   : > { %s382_s8 = scalar_lea.hbm %s736_s0, 256  ;;  %p383_p5 = scmp.lt.u32.totalorder %s595_s28, %s736_s0 }
  0x1a   : > { %p380_p4 = pnand %p379_p3, %p378_p2  ;;  %p384_p8 = scmp.lt.u32.totalorder %s382_s8, %s377_s5 }
  0x1b   : > { %p386_p9 = scmp.lt.u32.totalorder %s377_s5, %s595_s28 }
  0x1c   : > { %p381_p7 = pneg %p380_p4  ;;  %p385_p10 = por %p384_p8, %p383_p5 }
  0x1e   : > { %p387_p0 = por %p386_p9, %p385_p10 }
  0x20   : > { %p388_p1 = pnand %p387_p0, %p381_p7 }
  0x22   : > { %391 = shalt.err (!%p388_p1)
}
  0x23   : > { %s392_s17 = scalar_lea.vmem %s605_s30, 128  ;;  %s509_s19 = smov [#allocation2]  }
  0x24   : > { %p393_p2 = scmp.ne.s32.totalorder %s605_s30, %s392_s17  ;;  %s397_s26 = sshll.u32 %s509_s19, 4  ;;  %s398_s26 = int_to_ptr.vmem [resolvable:$false] %s397_s26 }
  0x25   : > { %s399_s27 = scalar_lea.vmem %s398_s26, 256  ;;  %p400_p11 = scmp.lt.s32.totalorder %s605_s30, %s398_s26 }
  0x26   : > { %p395_p4 = pnand %p393_p2, %p379_p3  ;;  %p401_p5 = scmp.lt.s32.totalorder %s399_s27, %s392_s17 }
  0x28   : > { %p396_p12 = pneg %p395_p4  ;;  %p402_p8 = por %p401_p5, %p400_p11 }
  0x2a   : > { %p403_p9 = pnand %p402_p8, %p396_p12 }
  0x2c   : > { %406 = shalt.err (!%p403_p9)
}
  0x2d   : > { %335 = dma.hbm_to_vmem [thread:$0]  (!%p601_p13), %s595_s28, 128, %s605_s30, %s118_s4  }
  0x2e   : > { %p746_p0 = scmp.lt.s32.totalorder %s507_s12, 3  ;;  %p747_p1 = scmp.ge.s32.totalorder %s507_s12, 1 }
  0x2f   : > { %s648_s7 = scalar_lea.hbm %s737_s1, %s315_s24  ;;  %s139_s8 = scalar_lea.vmem [#allocation5], %s314_s25 }
  0x30   : > { %p639_p7 = pnand %p747_p1, %p746_p0  ;;  %s146_s14 = sshll.u32 %s139_s8, 4  ;;  %s147_s14 = int_to_ptr.vmem [resolvable:$true] %s146_s14 }
  0x31   : > { %s136_s28 = scalar_lea.sflag [#allocation6], %s586_s23  ;;  %s407_s30 = scalar_lea.hbm %s648_s7, 128 }
  0x32   : > { %s748_s29 = scalar_select %p639_p7, 1, 0 }
  0x33   : > { %p408_p11 = scmp.ne.s32.totalorder %s648_s7, %s407_s30  ;;  %s412_s24 = scalar_lea.hbm %s737_s1, 256 }
  0x34   : > { %p413_p2 = scmp.lt.u32.totalorder %s648_s7, %s737_s1  ;;  %p414_p4 = scmp.lt.u32.totalorder %s412_s24, %s407_s30 }
  0x35   : > { %p410_p12 = pnand %p408_p11, %p379_p3  ;;  %p416_p8 = scmp.lt.u32.totalorder %s407_s30, %s648_s7 }
  0x36   : > { %p415_p5 = por %p414_p4, %p413_p2 }
  0x37   : > { %p411_p10 = pneg %p410_p12 }
  0x38   : > { %p417_p9 = por %p416_p8, %p415_p5 }
  0x3a   : > { %p418_p0 = pnand %p417_p9, %p411_p10 }
  0x3c   : > { %421 = shalt.err (!%p418_p0)
}
  0x3d   : > { %s422_s23 = scalar_lea.vmem %s147_s14, 128  ;;  %s510_s25 = smov [#allocation5]  }
  0x3e   : > { %p423_p1 = scmp.ne.s32.totalorder %s147_s14, %s422_s23  ;;  %s427_s26 = sshll.u32 %s510_s25, 4  ;;  %s428_s26 = int_to_ptr.vmem [resolvable:$false] %s427_s26 }
  0x3f   : > { %s429_s27 = scalar_lea.vmem %s428_s26, 256  ;;  %p430_p6 = scmp.lt.s32.totalorder %s147_s14, %s428_s26 }
  0x40   : > { %p425_p11 = pnand %p423_p1, %p379_p3  ;;  %p431_p7 = scmp.lt.s32.totalorder %s429_s27, %s422_s23 }
  0x42   : > { %p426_p12 = pneg %p425_p11  ;;  %p432_p2 = por %p431_p7, %p430_p6 }
  0x44   : > { %p433_p4 = pnand %p432_p2, %p426_p12 }
  0x46   : > { %436 = shalt.err (!%p433_p4)
}
  0x47   : > { %338 = dma.hbm_to_vmem [thread:$0]  (!%p601_p13), %s648_s7, 128, %s147_s14, %s136_s28  }
  0x48   : > { %p749_p10 = scmp.ne.s32.totalorder %s748_s29, 0 }
  0x49   : > { %s675_s5 = sand.u32 (!%p749_p10), 1, %s499_s10   ;;  %p750_p3 = scmp.ne.s32.totalorder (!%p749_p10), %s742_s20, 0 }
  0x4a   : > { %155 = sbr.rel (%p749_p10) target bundleno = 110 (0x6e), region = 28  ;;  %s319_s6 = sshll.u32 (!%p749_p10), %s675_s5, 3 }
  0x4b   : > { %s158_s8 = scalar_lea.sflag (!%p749_p10), [#allocation3], %s675_s5  ;;  %s161_s30 = scalar_lea.vmem (!%p749_p10), [#allocation2], %s319_s6 }
  0x51   : > { %482 = dma.done.wait (%p750_p3), %s158_s8, 128  }
  0x52   : > { %484 = vsyncadd (%p750_p3), %s158_s8, 4294967168  ;;  %s167_s3 = scalar_lea.sflag [#allocation6], %s675_s5  ;;  %s170_s7 = scalar_lea.vmem [#allocation5], %s319_s6 }
  0x53   : > { %486 = dma.done.wait (%p750_p3), %s167_s3, 128  }
  0x54   : > { %488 = vsyncadd (%p750_p3), %s167_s3, 4294967168  ;;  %v196_v0 = vld [vmem:[%s161_s30] sm:$0xff]  ;;  %v197_v1 = vld [vmem:[%s170_s7] sm:$0xff]  ;;  %s195_s29 = scalar_lea.vmem [#allocation7], %s319_s6  ;;  %s323_s28 = sshll.u32 %s548_s13, 7 }
  0x55   : > { %v198_v2 = vmax.f32 %v196_v0, %v197_v1  ;;  %v200_v3 = vsub.f32 %v196_v0, %v197_v1  ;;  %s218_s14 = sshll.u32 %s195_s29, 4  ;;  %s694_s20 = scalar_lea.hbm %s738_s2, %s323_s28  ;;  %s689_s14 = int_to_ptr.vmem [resolvable:$true] %s218_s14 }
  0x56   : > { %s205_s24 = scalar_lea.sflag [#allocation4], %s675_s5  ;;  %s437_s17 = scalar_lea.vmem %s689_s14, 128 }
  0x57   : > { %v199_v4 = vadd.f32 0.1, %v198_v2  ;;  %v201_v5 = vmul.f32 %v200_v3, %v200_v3  ;;  %p438_p6 = scmp.ne.s32.totalorder %s689_s14, %s437_s17  ;;  %p751_p13 = scmp.ne.s32.totalorder %s743_s21, 0 }
  0x58   : > { %s511_s13 = smov [#allocation7]  }
  0x59   : > { %v202_v6 = vmul.f32 %v201_v5, %v199_v4  ;;  %p439_p7 = pnand %p438_p6, %p751_p13  ;;  %s441_s19 = sshll.u32 %s511_s13, 4  ;;  %s442_s19 = int_to_ptr.vmem [resolvable:$false] %s441_s19 }
  0x5a   : > { %s443_s23 = scalar_lea.vmem %s442_s19, 256  ;;  %p444_p8 = scmp.lt.s32.totalorder %s689_s14, %s442_s19 }
  0x5b   : > { %203 = vst [vmem:[%s195_s29] sm:$0xff] %v202_v6  ;;  %p440_p5 = pneg %p439_p7  ;;  %p445_p9 = scmp.lt.s32.totalorder %s443_s23, %s437_s17 }
  0x5d   : > { %p446_p0 = por %p445_p9, %p444_p8 }
  0x5f   : > { %p447_p1 = pnand %p446_p0, %p440_p5 }
  0x61   : > { %450 = shalt.err (!%p447_p1)
}
  0x62   : > { %s451_s25 = scalar_lea.hbm %s694_s20, 128  ;;  %s455_s5 = scalar_lea.hbm %s738_s2, 256 }
  0x63   : > { %p452_p11 = scmp.ne.s32.totalorder %s694_s20, %s451_s25  ;;  %p456_p4 = scmp.lt.u32.totalorder %s694_s20, %s738_s2 }
  0x64   : > { %p457_p10 = scmp.lt.u32.totalorder %s455_s5, %s451_s25  ;;  %p459_p6 = scmp.lt.u32.totalorder %s451_s25, %s694_s20 }
  0x65   : > { %p453_p12 = pnand %p452_p11, %p751_p13 }
  0x66   : > { %p458_p3 = por %p457_p10, %p456_p4 }
  0x67   : > { %p454_p2 = pneg %p453_p12 }
  0x68   : > { %p460_p7 = por %p459_p6, %p458_p3 }
  0x6a   : > { %p461_p5 = pnand %p460_p7, %p454_p2 }
  0x6c   : > { %464 = shalt.err (!%p461_p5)
}
  0x6d   : > { %330 = dma.vmem_to_hbm [thread:$0]  (%p751_p13), %s689_s14, 128, %s694_s20, %s205_s24  }
  0x6e PF: > { %s230_s30 = sand.u32 1, %s495_s9   ;;  %p752_p8 = scmp.ne.s32.totalorder %s744_s22, 0 }
  0x6f   : > { %p753_p9 = scmp.ge.s32.totalorder %s507_s12, 2  ;;  %s231_s3 = scalar_lea.sflag [#allocation4], %s230_s30 }
  0x71   : > { %p340_p0 = pnand %p753_p9, %p752_p8 }
  0x73   : > { %490 = dma.done.wait (!%p340_p0), %s231_s3, 128  }
  0x74   : > { %492 = vsyncadd (!%p340_p0), %s231_s3, 4294967168  ;;  %p18_p1 = scmp.ge.s32.totalorder %s552_s15, 4   ;;  %s754_s9 = smov %s499_s10 }
  0x75   : > { %s755_s10 = smov %s503_s11  ;;  %s756_s11 = smov %s564_s18 }
  0x76   : > { %s757_s12 = smov %s552_s15  ;;  %20 = sbr.rel (!%p18_p1) target bundleno = 7 (0x7), region = 86 }
  0x7d   :  { %236 = vsyncpa [#allocation3], 1 }
  0x7e   :  { %238 = vsyncpa [#allocation3 + $0x1], 1 }
  0x7f   :  { %239 = vsyncpa [#allocation6], 1 }
  0x80   :  { %241 = vsyncpa [#allocation6 + $0x1], 1 }
  0x81   :  { %242 = vsyncpa [#allocation4], 1 }
  0x82   :  { %244 = vsyncpa [#allocation4 + $0x1], 1 }

</bundles_post_ra>
